<compile_context>
chip_gen: v7x
topology: tpu7x:2x2x1
jax: 0.10.0
libtpu: 0.0.40
codegen_flags: <defaults>
</compile_context>

<pallas_src>
import functools

import jax
import jax.numpy as jnp
from jax.experimental import pallas as pl
from jax.experimental.pallas import tpu as pltpu

_LANE = 128      # lane width (last-dim alignment)
_SUBLANE = 8     # sublane width (second-to-last-dim alignment)


def _round_up(x, m):
    return (x + m - 1) // m * m


def _mlp_kernel(x_ref, w1_ref, b1_ref, w2_ref, b2_ref, o_ref):
    # Fused hot path: two MXU matmuls (bf16 inputs, f32 accumulation) + f32 bias/ReLU, all VMEM.
    x = x_ref[...]                                            # (TB, D)  bf16
    h = jnp.dot(x, w1_ref[...],
                preferred_element_type=jnp.float32)           # (TB, H)  f32 acc
    h = jnp.maximum(h + b1_ref[...], 0.0)                     # bias + ReLU in f32 (VPU)
    y = jnp.dot(h.astype(w2_ref.dtype), w2_ref[...],
                preferred_element_type=jnp.float32)           # (TB, C)  f32 acc
    o_ref[...] = (y + b2_ref[...]).astype(o_ref.dtype)        # direct (TB, C) store, no padding


def prepare_params(w1, b1, w2, b2):
    """One-time (hoisted) static parameter prep: bf16 weights for the MXU, f32 (1, N) biases."""
    return (w1.astype(jnp.bfloat16), b1.reshape(1, -1).astype(jnp.float32),
            w2.astype(jnp.bfloat16), b2.reshape(1, -1).astype(jnp.float32))


def _batch_tile(B, block_b):
    """Batch tile: multiple of 256 for large B (MXU cadence, >=2 grid steps for v7x's 2 TCs);
    sublane-aligned single step for small B. Never requires padding/copying x."""
    if B >= 2 * 256:
        tb = min(block_b, _round_up(B, 256) // 2)   # keep >= 2 grid steps
        return max(256, (tb // 256) * 256)
    return _round_up(min(max(block_b, _SUBLANE), B), _SUBLANE)


@functools.partial(jax.jit, static_argnames=("block_b",))
def mlp_forward(x, w1, b1, w2, b2, *, block_b=2048):
    """Fused MLP forward.

    x: (B, D); w1: (D, H) bf16; b1: (1, H) f32; w2: (H, C) bf16; b2: (1, C) f32.
    Returns (B, C) f32.
    """
    B, D = x.shape
    H = w1.shape[1]
    C = w2.shape[1]
    assert w1.shape == (D, H) and b1.shape == (1, H)
    assert w2.shape == (H, C) and b2.shape == (1, C)

    # Cast activations to bf16 for the MXU (no-op if the caller already supplies bf16).
    x = x.astype(jnp.bfloat16)

    tb = _batch_tile(B, block_b)
    grid = (pl.cdiv(B, tb),)   # ragged last block handled by Pallas masking -- no x pad copy

    out = pl.pallas_call(
        _mlp_kernel,
        out_shape=jax.ShapeDtypeStruct((B, C), jnp.float32),
        grid_spec=pltpu.PrefetchScalarGridSpec(
            num_scalar_prefetch=0,
            grid=grid,
            in_specs=[
                # x: tiled over the batch grid axis (last dim == full D, so no lane constraint).
                pl.BlockSpec((tb, D), lambda i: (i, 0)),
                # Weights / biases: constant block index -> VMEM-resident, DMA'd once.
                pl.BlockSpec((D, H), lambda i: (0, 0)),
                pl.BlockSpec((1, H), lambda i: (0, 0)),
                pl.BlockSpec((H, C), lambda i: (0, 0)),
                pl.BlockSpec((1, C), lambda i: (0, 0)),
            ],
            # Output written directly at (tb, C): last dim equals the full array dim (legal),
            # so no padded columns are ever written to HBM and no post-kernel slice is needed.
            out_specs=pl.BlockSpec((tb, C), lambda i: (i, 0)),
        ),
        compiler_params=pltpu.CompilerParams(
            # Batch axis is independent work -> shard across TCs on v7x; neutral on v5e/v6e.
            dimension_semantics=("parallel",),
            # Explicit budget with headroom; safe on v7x's 64 MiB physical VMEM.
            vmem_limit_bytes=32 * 1024 * 1024,
        ),
    )(x, w1, b1, w2, b2)

    return out


if __name__ == "__main__":
    # Small shapes consistent with the module: input_dim=32, hidden=128, num_classes=10.
    D, H, C = 32, 128, 10

    key = jax.random.PRNGKey(0)
    kx, kw1, kb1, kw2, kb2, kx2, kx3 = jax.random.split(key, 7)

    # Deterministic synthetic parameters (nn.Linear shapes, stored transposed as (in, out)).
    w1_f32 = jax.random.normal(kw1, (D, H), dtype=jnp.float32) * 0.05
    b1_f32 = jax.random.normal(kb1, (1, H), dtype=jnp.float32) * 0.01
    w2_f32 = jax.random.normal(kw2, (H, C), dtype=jnp.float32) * 0.05
    b2_f32 = jax.random.normal(kb2, (1, C), dtype=jnp.float32) * 0.01

    # One-time (hoisted) weight prep: bf16 weights, f32 biases.
    w1, b1, w2, b2 = prepare_params(w1_f32, b1_f32, w2_f32, b2_f32)

    def ref_fn(x):
        # Full-f32 reference; kernel uses bf16 inputs with f32 accumulation, so compare loosely.
        return jnp.maximum(x @ w1_f32 + b1_f32, 0.0) @ w2_f32 + b2_f32

    def check(x):
        out = jax.block_until_ready(mlp_forward(x, w1, b1, w2, b2))
        assert out.shape == (x.shape[0], C)
        assert jnp.allclose(out, ref_fn(x), atol=5e-2, rtol=5e-2), (
            float(jnp.max(jnp.abs(out - ref_fn(x)))))

    # Case 1: small aligned batch (single grid step).
    check(jax.random.normal(kx, (8, D), dtype=jnp.float32))

    # Case 2: unaligned small batch (exercises the masked partial block, no padding copy).
    check(jax.random.normal(kx2, (13, D), dtype=jnp.float32))

    # Case 3: larger batch (multi-step grid with a ragged last tile; >=2 steps for v7x TCs).
    check(jax.random.normal(kx3, (1000, D), dtype=jnp.float32))

    print("KERNEL_OK")
</pallas_src>

<mosaic_0001>
module attributes {stable_mosaic.version = 11 : i64} {
  func.func @_mlp_kernel(%arg0: i32, %arg1: memref<8x32xbf16, #tpu.memory_space<vmem>>, %arg2: memref<32x128xbf16, #tpu.memory_space<vmem>>, %arg3: memref<1x128xf32, #tpu.memory_space<vmem>>, %arg4: memref<128x10xbf16, #tpu.memory_space<vmem>>, %arg5: memref<1x10xf32, #tpu.memory_space<vmem>>, %arg6: memref<8x10xf32, #tpu.memory_space<vmem>>) attributes {dimension_semantics = [#tpu.dimension_semantics<parallel>], iteration_bounds = array<i64: 1>, scalar_prefetch = 0 : i64, scratch_operands = 0 : i64, tpu.core_type = #tpu.core_type<tc>, window_params = [{transform_indices = @transform_0, window_bounds = array<i64: 8, 32>}, {pipeline_mode = #tpu.pipeline_mode<synchronous>, transform_indices = @transform_1, window_bounds = array<i64: 32, 128>}, {pipeline_mode = #tpu.pipeline_mode<synchronous>, transform_indices = @transform_2, window_bounds = array<i64: 1, 128>}, {pipeline_mode = #tpu.pipeline_mode<synchronous>, transform_indices = @transform_3, window_bounds = array<i64: 128, 10>}, {pipeline_mode = #tpu.pipeline_mode<synchronous>, transform_indices = @transform_4, window_bounds = array<i64: 1, 10>}, {transform_indices = @transform_5, window_bounds = array<i64: 8, 10>}]} {
    %c0 = arith.constant 0 : index
    %c0_0 = arith.constant 0 : index
    %0 = vector.load %arg1[%c0, %c0_0] : memref<8x32xbf16, #tpu.memory_space<vmem>>, vector<8x32xbf16>
    %c0_1 = arith.constant 0 : index
    %c0_2 = arith.constant 0 : index
    %1 = vector.load %arg2[%c0_1, %c0_2] : memref<32x128xbf16, #tpu.memory_space<vmem>>, vector<32x128xbf16>
    %cst = arith.constant dense<0.000000e+00> : vector<8x128xf32>
    %2 = tpu.matmul %0, %1, %cst {dimension_numbers = #tpu.dot_dimension_numbers<[1], [0], [0], [1], [0, 0, 1, 1], [], []>} : vector<8x32xbf16>, vector<32x128xbf16>, vector<8x128xf32> -> vector<8x128xf32>
    %c0_3 = arith.constant 0 : index
    %c0_4 = arith.constant 0 : index
    %3 = vector.load %arg3[%c0_3, %c0_4] : memref<1x128xf32, #tpu.memory_space<vmem>>, vector<1x128xf32>
    %4 = vector.broadcast %3 : vector<1x128xf32> to vector<8x128xf32>
    %5 = arith.addf %2, %4 : vector<8x128xf32>
    %cst_5 = arith.constant 0.000000e+00 : f32
    %6 = vector.broadcast %cst_5 : f32 to vector<8x128xf32>
    %7 = arith.maximumf %5, %6 : vector<8x128xf32>
    %8 = arith.truncf %7 : vector<8x128xf32> to vector<8x128xbf16>
    %c0_6 = arith.constant 0 : index
    %c0_7 = arith.constant 0 : index
    %9 = vector.load %arg4[%c0_6, %c0_7] : memref<128x10xbf16, #tpu.memory_space<vmem>>, vector<128x10xbf16>
    %cst_8 = arith.constant dense<0.000000e+00> : vector<8x10xf32>
    %10 = tpu.matmul %8, %9, %cst_8 {dimension_numbers = #tpu.dot_dimension_numbers<[1], [0], [0], [1], [0, 0, 1, 1], [], []>} : vector<8x128xbf16>, vector<128x10xbf16>, vector<8x10xf32> -> vector<8x10xf32>
    %c0_9 = arith.constant 0 : index
    %c0_10 = arith.constant 0 : index
    %11 = vector.load %arg5[%c0_9, %c0_10] : memref<1x10xf32, #tpu.memory_space<vmem>>, vector<1x10xf32>
    %12 = vector.broadcast %11 : vector<1x10xf32> to vector<8x10xf32>
    %13 = arith.addf %10, %12 : vector<8x10xf32>
    %c0_11 = arith.constant 0 : index
    %c0_12 = arith.constant 0 : index
    %14 = vector.load %arg6[%c0_11, %c0_12] : memref<8x10xf32, #tpu.memory_space<vmem>>, vector<8x10xf32>
    tpu.vector_store %arg6[%c0_11, %c0_12], %13 {strides = array<i32>} : memref<8x10xf32, #tpu.memory_space<vmem>>, vector<8x10xf32>,
    return
  }
  func.func @transform_0(%arg0: i32) -> (i32, i32) {
    %c0_i32 = arith.constant 0 : i32
    %c0_i32_0 = arith.constant 0 : i32
    return %arg0, %c0_i32 : i32, i32
  }
  func.func @transform_1(%arg0: i32) -> (i32, i32) {
    %c0_i32 = arith.constant 0 : i32
    %c0_i32_0 = arith.constant 0 : i32
    %c0_i32_1 = arith.constant 0 : i32
    return %c0_i32, %c0_i32_0 : i32, i32
  }
  func.func @transform_2(%arg0: i32) -> (i32, i32) {
    %c0_i32 = arith.constant 0 : i32
    %c0_i32_0 = arith.constant 0 : i32
    %c0_i32_1 = arith.constant 0 : i32
    return %c0_i32, %c0_i32_0 : i32, i32
  }
  func.func @transform_3(%arg0: i32) -> (i32, i32) {
    %c0_i32 = arith.constant 0 : i32
    %c0_i32_0 = arith.constant 0 : i32
    %c0_i32_1 = arith.constant 0 : i32
    return %c0_i32, %c0_i32_0 : i32, i32
  }
  func.func @transform_4(%arg0: i32) -> (i32, i32) {
    %c0_i32 = arith.constant 0 : i32
    %c0_i32_0 = arith.constant 0 : i32
    %c0_i32_1 = arith.constant 0 : i32
    return %c0_i32, %c0_i32_0 : i32, i32
  }
  func.func @transform_5(%arg0: i32) -> (i32, i32) {
    %c0_i32 = arith.constant 0 : i32
    %c0_i32_0 = arith.constant 0 : i32
    return %arg0, %c0_i32 : i32, i32
  }
}

</mosaic_0001>

<bundles_post_ra>
// kernel: mlp_forward.1
= control target key start
LH: loop header
LB: loop body
LE: loop exit
PB: predicated region body
PF: predicated region fallthrough
CT: control target
= control target key end

     0   :  { %v309_v1 = vmov 0.0   ;;  %vm310_vm0 = vmmov 0   ;;  %vm46_vm1 = vcmask 261120   ;;  %s393_s0 = inlined_call_operand.vmem [shape: bf16[8,32], index: 0, kind: input, shape index: {}]   ;;  %s394_s1 = inlined_call_operand.vmem [shape: bf16[32,128], index: 1, kind: input, shape index: {}]   ;;  %s395_s2 = inlined_call_operand.vmem [shape: f32[1,128], index: 2, kind: input, shape index: {}]   ;;  %s396_s3 = inlined_call_operand.vmem [shape: bf16[128,10], index: 3, kind: input, shape index: {}]   ;;  %s397_s4 = inlined_call_operand.vmem [shape: f32[1,10], index: 4, kind: input, shape index: {}]   ;;  %s398_s5 = inlined_call_operand.hbm [shape: f32[8,10], index: 5, kind: output, shape index: {}]  }
   0x1   :  { %v275_v0 = vld [vmem:[%s394_s1] sm:$0xff]   ;;  %244 = vmatprep.subr.bf16.mxu0 %v309_v1  ;;  %252 = vmatprep.subr.bf16.mxu1 %v309_v1  ;;  %v276_v2 = vld [vmem:[%s394_s1 + $0x8] sm:$0xff]   ;;  %v279_v6 = vld [vmem:[%s396_s3 + $0x10] sm:$0xff]  }
   0x2   :  { %245 = vmatpush3.bf16.msra.mxu0 %v275_v0  ;;  %248 = vmatprep.mubr.msk.bf16.mxu0 %vm310_vm0, %v309_v1  ;;  %v277_v3 = vld [vmem:[%s396_s3] sm:$0xff]   ;;  %v278_v4 = vld [vmem:[%s396_s3 + $0x8] sm:$0xff]  }
   0x3   :  { %246 = vmatprep.subr.bf16.mxu0 %v309_v1  ;;  %268 = vmatprep.mubr.msk.bf16.mxu1 %vm310_vm0, %v309_v1  ;;  %v22_v5 = vld [vmem:[%s393_s0] sm:$0xf] }
   0x4   :  { %253 = vmatpush3.bf16.msra.mxu1 %v277_v3 }
   0x5   :  { %254 = vmatprep.subr.bf16.mxu1 %v309_v1 }
   0x6   :  { %247 = vmatpush3.bf16.msra.mxu0 %v276_v2 }
   0x8   :  { %255 = vmatpush3.bf16.msra.mxu1 %v278_v4 }
   0x9   :  { %249 = vmatmul.mubr.msk.bf16.vlgmr.msra.gmra.mrb[0].mxu0 %vm46_vm1, %v22_v5  ;;  %256 = vmatprep.subr.bf16.mxu1 %v309_v1 }
   0xa   :  { %10 = vsyncpa [#allocation3], 0  ;;  %v280_v7 = vld [vmem:[%s396_s3 + $0x18] sm:$0xff]   ;;  %v281_v8 = vld [vmem:[%s396_s3 + $0x20] sm:$0xff]   ;;  %s311_s17 = smov [#allocation2]   ;;  %vm203_vm2 = vcmask 80896  }
   0xb   :  { %v282_v9 = vld [vmem:[%s396_s3 + $0x28] sm:$0xff]   ;;  %v283_v10 = vld [vmem:[%s396_s3 + $0x30] sm:$0xff]   ;;  %v284_v11 = vld [vmem:[%s396_s3 + $0x38] sm:$0xff]   ;;  %s211_s18 = sshll.u32 %s311_s17, 4  ;;  %s212_s18 = int_to_ptr.vmem [resolvable:$true] %s211_s18 }
   0xc   :  { %257 = vmatpush3.bf16.msra.mxu1 %v279_v6  ;;  %v219_v12 = vld [vmem:[%s395_s2] ss:$0 sm:$0xff]  ;;  %s285_s2 = scalar_lea.vmem %s212_s18, 128  ;;  %p290_p1 = scmp.lt.s32.totalorder %s212_s18, %s212_s18 }
   0xd   :  { %258 = vmatprep.subr.bf16.mxu1 %v309_v1  ;;  %v223_v20 = vld [vmem:[%s397_s4] ss:$0 sm:$0xff]  ;;  %p286_p0 = scmp.ne.s32.totalorder %s212_s18, %s285_s2  ;;  %p291_p2 = scmp.lt.s32.totalorder %s285_s2, %s285_s2 }
   0xf   :  { %p292_p3 = por %p291_p2, %p290_p1 }
  0x10   :  { %259 = vmatpush3.bf16.msra.mxu1 %v280_v7 }
  0x11   :  { %260 = vmatprep.subr.bf16.mxu1 %v309_v1  ;;  %p293_p4 = pnand %p292_p3, %p286_p0 }
  0x14   :  { %261 = vmatpush3.bf16.msra.mxu1 %v281_v8 }
  0x15   :  { %262 = vmatprep.subr.bf16.mxu1 %v309_v1 }
  0x18   :  { %263 = vmatpush3.bf16.msra.mxu1 %v282_v9 }
  0x19   :  { %264 = vmatprep.subr.bf16.mxu1 %v309_v1 }
  0x1c   :  { %265 = vmatpush3.bf16.msra.mxu1 %v283_v10 }
  0x1d   :  { %266 = vmatprep.subr.bf16.mxu1 %v309_v1 }
  0x20   :  { %267 = vmatpush3.bf16.msra.mxu1 %v284_v11 }
  0xdc   :  { %v84_v13 = vpop.f32.mrb[0].mxu0 }
  0xdd   :  { %v85_v14 = vadd.f32 %v219_v12, %v84_v13  ;;  %v250_v15 = vpop.f32.mrb[1].mxu0 }
  0xde   :  { %v87_v16 = vpop.f32.mrb[2].mxu0 }
  0xdf   :  { %v90_v17 = vmax.f32 %v85_v14, 0.0  ;;  %v251_v18 = vpop.f32.mrb[3].mxu0 }
  0xe1   :  { %v91_v19 = vpack.c.bf16 %v90_v17, %v90_v17 }
  0xe3   :  { %269 = vmatmul.mubr.bf16.vlgmr.msra.gmra.mrb[0].mxu1 %v91_v19 }
 0x1b6   :  { %v197_v21 = vpop.f32.mrb[0].mxu1 }
 0x1b7   :  { %v198_v22 = vadd.f32 %v223_v20, %v197_v21  ;;  %v270_v23 = vpop.f32.mrb[1].mxu1 }
 0x1b8   :  { %v200_v24 = vpop.f32.mrb[2].mxu1 }
 0x1b9   :  { %v271_v25 = vpop.f32.mrb[3].mxu1  ;;  %204 = vst.msk [vmem:[#allocation2] sm:$0xff] %vm203_vm2, %v198_v22 }
 0x1ba   :  { %296 = shalt.err (!%p293_p4)
}
 0x1bb   :  { %s297_s4 = scalar_lea.hbm %s398_s5, 128 }
 0x1bc   :  { %p298_p5 = scmp.ne.s32.totalorder %s398_s5, %s297_s4  ;;  %p301_p6 = scmp.lt.u32.totalorder %s297_s4, %s398_s5 }
 0x1be   :  { %p303_p7 = pnand %p301_p6, %p298_p5 }
 0x1c0   :  { %306 = shalt.err (!%p303_p7)
}
 0x1c1   :  { %214 = dma.vmem_to_hbm [thread:$0]  %s212_s18, 128, %s398_s5, [#allocation3]  }
 0x1c2   :  { %307 = dma.done.wait [#allocation3], 128  }
 0x1c3   :  { %308 = vsyncadd [#allocation3], 4294967168 }
 0x1c4   :  { %218 = vsyncpa [#allocation3], 1 }

</bundles_post_ra>
